<compile_context>
chip_gen: v6e
topology: v6e:2x2x1
jax: 0.10.0
libtpu: 0.0.40
codegen_flags: <defaults>
</compile_context>

<pallas_src>
import functools

import jax
import jax.numpy as jnp
from jax import lax
from jax.experimental import pallas as pl
from jax.experimental.pallas import tpu as pltpu

EPS = 1e-5
LANE = 128                      # pad channel dims to multiples of this
MATMUL_DTYPE = jnp.bfloat16     # MXU-native matmul inputs; accumulation stays f32
VMEM_LIMIT = 32 * 1024 * 1024   # explicit scoped-VMEM budget
MAX_TILE_MM = 512               # rows / tile for the matmul kernels
MAX_TILE_EPI = 1024             # rows / tile for the (mem-bound) epilogue kernel
TILE_BYTE_BUDGET = 20 * 1024 * 1024  # conservative per-call tile working-set cap


def _round_up(n, m):
    return (n + m - 1) // m * m


def _pick_tile(m, row_bytes, max_tile):
    """Pick (tile, m_pad) with tile | m_pad, tile lane/sublane friendly and within
    a conservative VMEM budget.  Prefers a divisor of m (no row padding needed)."""
    cap = max(8, min(max_tile, TILE_BYTE_BUDGET // max(row_bytes, 1)))
    cap = min(cap, m) if m >= 8 else m
    for t in range(cap, 0, -1):
        if m % t == 0 and (t % 8 == 0 or t == m):
            return t, m
    t = max(8, cap - cap % 8)
    return t, _round_up(m, t)


# ----------------------------------------------------------------------------
# Kernel 1: flat matmul + BN statistics partials (+ optional fused BN/ReLU
#           prologue applied to the input tile)
# ----------------------------------------------------------------------------
def _mm_stats_kernel(*refs, prologue, masked, m_real, tile_m):
    if prologue:
        x_ref, w_ref, sc_ref, sh_ref, y_ref, stat_ref = refs
    else:
        x_ref, w_ref, y_ref, stat_ref = refs

    x = x_ref[...]
    if prologue:
        # fused epilogue of the *previous* stage: BN scale/shift + ReLU (VPU)
        xf = x.astype(jnp.float32) * sc_ref[...] + sh_ref[...]
        x = jnp.maximum(xf, 0.0).astype(MATMUL_DTYPE)

    y = jnp.dot(x, w_ref[...], preferred_element_type=jnp.float32)
    y_ref[...] = y.astype(y_ref.dtype)

    if masked:
        # only needed when padded rows produce nonzero values (prologue active)
        rows = (pl.program_id(0) * tile_m
                + lax.broadcasted_iota(jnp.int32, y.shape, 0))
        y = jnp.where(rows < m_real, y, 0.0)

    stat_ref[0, 0:1, :] = jnp.sum(y, axis=0, keepdims=True)
    stat_ref[0, 1:2, :] = jnp.sum(y * y, axis=0, keepdims=True)


def _matmul_stats(x2d, w, *, scale=None, shift=None, m_real,
                  out_dtype=MATMUL_DTYPE):
    """x2d: (M, K) bf16, w: (K, C) bf16 -> (y (M_pad, C), stats (nt, 2, C) f32)."""
    M, K = x2d.shape
    C = w.shape[1]
    prologue = scale is not None
    row_bytes = 4 * K + 4 * C + 16           # bf16 x/y double-buffered-ish
    tile, m_pad = _pick_tile(M, row_bytes, MAX_TILE_MM)
    if m_pad != M:
        x2d = jnp.pad(x2d, ((0, m_pad - M), (0, 0)))
    nt = m_pad // tile
    masked = prologue and (m_pad != m_real)

    args = [x2d, w]
    specs = [pl.BlockSpec((tile, K), lambda i: (i, 0)),
             pl.BlockSpec((K, C), lambda i: (0, 0))]
    if prologue:
        args += [scale, shift]
        specs += [pl.BlockSpec((1, K), lambda i: (0, 0)),
                  pl.BlockSpec((1, K), lambda i: (0, 0))]

    kernel = functools.partial(_mm_stats_kernel, prologue=prologue,
                               masked=masked, m_real=m_real, tile_m=tile)
    return pl.pallas_call(
        kernel,
        out_shape=(jax.ShapeDtypeStruct((m_pad, C), out_dtype),
                   jax.ShapeDtypeStruct((nt, 2, C), jnp.float32)),
        grid=(nt,),
        in_specs=specs,
        out_specs=(pl.BlockSpec((tile, C), lambda i: (i, 0)),
                   pl.BlockSpec((1, 2, C), lambda i: (i, 0, 0))),
        compiler_params=pltpu.CompilerParams(
            dimension_semantics=("parallel",),
            vmem_limit_bytes=VMEM_LIMIT),
    )(*args)


# ----------------------------------------------------------------------------
# Kernel 2: 3x3 stride-1 conv via in-kernel tap accumulation (no im2col)
# ----------------------------------------------------------------------------
def _conv2_tap_kernel(act_ref, w_ref, y_ref, stat_ref, slab_ref, sem_ref,
                      *, trh, wo, d):
    n = pl.program_id(0)
    r = pl.program_id(1)
    rows = trh + 2 * d
    # manual DMA of one halo slab (rows of the spatially padded activation)
    cp = pltpu.make_async_copy(act_ref.at[n, pl.ds(r * trh, rows)],
                               slab_ref, sem_ref)
    cp.start()
    cp.wait()

    c = y_ref.shape[-1]
    s_acc = jnp.zeros((1, c), jnp.float32)
    ss_acc = jnp.zeros((1, c), jnp.float32)
    for j in range(trh):                       # output rows of this tile
        acc = jnp.zeros((wo, c), jnp.float32)
        for kh in range(3):
            for kw in range(3):
                xt = slab_ref[kh * d + j, kw * d: kw * d + wo, :]   # (wo, C) bf16
                acc = acc + jnp.dot(xt, w_ref[kh * 3 + kw],
                                    preferred_element_type=jnp.float32)
        y_ref[0, j] = acc.astype(y_ref.dtype)
        s_acc = s_acc + jnp.sum(acc, axis=0, keepdims=True)
        ss_acc = ss_acc + jnp.sum(acc * acc, axis=0, keepdims=True)
    stat_ref[0, 0, 0:1, :] = s_acc
    stat_ref[0, 0, 1:2, :] = ss_acc


def _conv2_s1(act, w2t, *, dil):
    """act: (N, H+2d, W+2d, C) bf16 post-BN1-ReLU zero-padded; w2t: (9, C, C)."""
    N, Hp, Wp, C = act.shape
    H = Hp - 2 * dil
    W = Wp - 2 * dil
    cap = max(1, min(8, 512 // max(W, 1)))     # bound unroll / register pressure
    trh = 1
    for t in range(cap, 0, -1):
        if H % t == 0:
            trh = t
            break
    R = H // trh

    kernel = functools.partial(_conv2_tap_kernel, trh=trh, wo=W, d=dil)
    return pl.pallas_call(
        kernel,
        out_shape=(jax.ShapeDtypeStruct((N, H, W, C), MATMUL_DTYPE),
                   jax.ShapeDtypeStruct((N, R, 2, C), jnp.float32)),
        grid=(N, R),
        in_specs=[pl.BlockSpec(memory_space=pl.ANY),
                  pl.BlockSpec((9, C, C), lambda n, r: (0, 0, 0))],
        out_specs=(pl.BlockSpec((1, trh, W, C), lambda n, r: (n, r, 0, 0)),
                   pl.BlockSpec((1, 1, 2, C), lambda n, r: (n, r, 0, 0))),
        scratch_shapes=[pltpu.VMEM((trh + 2 * dil, Wp, C), MATMUL_DTYPE),
                        pltpu.SemaphoreType.DMA],
        compiler_params=pltpu.CompilerParams(
            dimension_semantics=("parallel", "parallel"),
            vmem_limit_bytes=VMEM_LIMIT),
    )(act, w2t)


# ----------------------------------------------------------------------------
# Kernel 3: final epilogue -- BN3 scale/shift + residual (add / fused 1x1
#           projection matmul) + ReLU
# ----------------------------------------------------------------------------
def _epilogue_kernel(*refs, mode):
    if mode == "project":
        y_ref, sc_ref, sh_ref, xs_ref, wm_ref, o_ref = refs
    elif mode == "add":
        y_ref, sc_ref, sh_ref, r_ref, o_ref = refs
    else:
        y_ref, sc_ref, sh_ref, o_ref = refs

    y = y_ref[...].astype(jnp.float32) * sc_ref[...] + sh_ref[...]
    if mode == "project":
        y = y + jnp.dot(xs_ref[...], wm_ref[...],
                        preferred_element_type=jnp.float32)
    elif mode == "add":
        y = y + r_ref[...].astype(jnp.float32)
    o_ref[...] = jnp.maximum(y, 0.0).astype(o_ref.dtype)


def _epilogue(y, scale, shift, *, residual=None, proj=None):
    M, C = y.shape
    row_bytes = 2 * C * 2 + 4 * C * 2          # bf16 y + f32 out (2 buffers)
    if proj is not None:
        row_bytes += 2 * proj[0].shape[1] * 2
    elif residual is not None:
        row_bytes += 2 * C * 2
    tile, m_pad = _pick_tile(M, row_bytes, MAX_TILE_EPI)

    def padrows(a):
        return a if a.shape[0] == m_pad else jnp.pad(
            a, ((0, m_pad - a.shape[0]), (0, 0)))

    args = [padrows(y), scale, shift]
    specs = [pl.BlockSpec((tile, C), lambda i: (i, 0)),
             pl.BlockSpec((1, C), lambda i: (0, 0)),
             pl.BlockSpec((1, C), lambda i: (0, 0))]
    if proj is not None:
        mode = "project"
        xs, wm = proj
        xs = padrows(xs)
        args += [xs, wm]
        specs += [pl.BlockSpec((tile, xs.shape[1]), lambda i: (i, 0)),
                  pl.BlockSpec(wm.shape, lambda i: (0, 0))]
    elif residual is not None:
        mode = "add"
        args += [padrows(residual)]
        specs += [pl.BlockSpec((tile, C), lambda i: (i, 0))]
    else:
        mode = "none"

    kernel = functools.partial(_epilogue_kernel, mode=mode)
    return pl.pallas_call(
        kernel,
        out_shape=jax.ShapeDtypeStruct((m_pad, C), jnp.float32),
        grid=(m_pad // tile,),
        in_specs=specs,
        out_specs=pl.BlockSpec((tile, C), lambda i: (i, 0)),
        compiler_params=pltpu.CompilerParams(
            dimension_semantics=("parallel",),
            vmem_limit_bytes=VMEM_LIMIT),
    )(*args)


# ----------------------------------------------------------------------------
# Glue helpers
# ----------------------------------------------------------------------------
def _bn_scale_shift(stats, gamma, beta, count):
    st = stats.reshape(-1, 2, stats.shape[-1]).sum(axis=0)   # (2, C)
    mean = st[0] / count
    var = jnp.maximum(st[1] / count - mean * mean, 0.0)       # biased (train mode)
    scale = gamma * lax.rsqrt(var + EPS)
    shift = beta - mean * scale
    return scale.reshape(1, -1), shift.reshape(1, -1)


def _pad2(w, r, c):
    return jnp.pad(w, ((0, r - w.shape[0]), (0, c - w.shape[1])))


def _pad1(v, c):
    v = v.reshape(-1)
    return jnp.pad(v, (0, c - v.shape[0])).astype(jnp.float32)


def _im2col_from_padded(xp, d, s, Ho, Wo):
    """xp: (N, H+2d, W+2d, C) already zero-padded -> (N*Ho*Wo, 9*C) tap-major."""
    N = xp.shape[0]
    C = xp.shape[-1]
    taps = []
    for kh in range(3):
        for kw in range(3):
            taps.append(xp[:, kh * d: kh * d + s * (Ho - 1) + 1: s,
                           kw * d: kw * d + s * (Wo - 1) + 1: s, :])
    pat = jnp.stack(taps, axis=3)            # (N, Ho, Wo, 9, C)
    return pat.reshape(N * Ho * Wo, 9 * C)


# ----------------------------------------------------------------------------
# Bottleneck forward
# ----------------------------------------------------------------------------
def bottleneck_forward(x, params, *, downsample=False, dilation=1):
    """x: (N, H, W, Cin) float32 NHWC."""
    N, H, W, Cin = x.shape
    Cmid = params["w1"].shape[1]
    Cout = params["w3"].shape[1]
    s = 2 if downsample else 1
    d = dilation
    need_match = (Cin != Cout) or downsample
    Ho = (H - 1) // s + 1
    Wo = (W - 1) // s + 1
    M1 = N * H * W
    M2 = N * Ho * Wo

    cin_p = _round_up(Cin, LANE)
    cmid_p = _round_up(Cmid, LANE)
    cout_p = _round_up(Cout, LANE)

    # pad weights / affine params once (zero-padded channels stay exactly zero)
    w1 = _pad2(params["w1"], cin_p, cmid_p).astype(MATMUL_DTYPE)
    w3 = _pad2(params["w3"], cmid_p, cout_p).astype(MATMUL_DTYPE)
    w2p = jnp.pad(params["w2"], ((0, 0), (0, 0),
                                 (0, cmid_p - Cmid), (0, cmid_p - Cmid)))
    g1, b1 = _pad1(params["g1"], cmid_p), _pad1(params["b1"], cmid_p)
    g2, b2 = _pad1(params["g2"], cmid_p), _pad1(params["b2"], cmid_p)
    g3, b3 = _pad1(params["g3"], cout_p), _pad1(params["b3"], cout_p)

    xp = jnp.pad(x, ((0, 0), (0, 0), (0, 0), (0, cin_p - Cin)))

    # --- conv1 (1x1) + BN1 stats --------------------------------------------
    x2d = xp.reshape(M1, cin_p).astype(MATMUL_DTYPE)
    y1, st1 = _matmul_stats(x2d, w1, m_real=M1)
    sc1, sh1 = _bn_scale_shift(st1, g1, b1, M1)
    if y1.shape[0] != M1:
        y1 = y1[:M1]

    # BN1-apply + ReLU + spatial zero-pad: one fused XLA elementwise pass
    act1 = jnp.maximum(y1.astype(jnp.float32) * sc1 + sh1, 0.0)
    act1 = act1.reshape(N, H, W, cmid_p)
    act1 = jnp.pad(act1, ((0, 0), (d, d), (d, d), (0, 0))).astype(MATMUL_DTYPE)

    # --- conv2 (3x3, dilation, padding=dilation) + BN2 stats -----------------
    if s == 1:
        w2t = w2p.reshape(9, cmid_p, cmid_p).astype(MATMUL_DTYPE)
        y2_4d, st2 = _conv2_s1(act1, w2t, dil=d)
        y2 = y2_4d.reshape(M2, cmid_p)
    else:
        # TODO(synk): strided (downsample) conv2 still materializes im2col
        # patches; phase-decomposing the stride-2 taps would remove it.
        w2f = w2p.reshape(9 * cmid_p, cmid_p).astype(MATMUL_DTYPE)
        patches = _im2col_from_padded(act1, d, s, Ho, Wo)
        y2, st2 = _matmul_stats(patches, w2f, m_real=M2)
        if y2.shape[0] != M2:
            y2 = y2[:M2]
    sc2, sh2 = _bn_scale_shift(st2, g2, b2, M2)

    # --- conv3 (1x1) with fused BN2-apply + ReLU prologue + BN3 stats --------
    y3, st3 = _matmul_stats(y2, w3, scale=sc2, shift=sh2, m_real=M2)
    sc3, sh3 = _bn_scale_shift(st3, g3, b3, M2)

    # --- epilogue: BN3 apply + residual + final ReLU --------------------------
    if need_match:
        wm = _pad2(params["wm"], cin_p, cout_p).astype(MATMUL_DTYPE)
        xs = xp[:, ::s, ::s, :].reshape(M2, cin_p).astype(MATMUL_DTYPE)
        out = _epilogue(y3, sc3, sh3, proj=(xs, wm))
    else:
        res = xp.reshape(M1, cin_p).astype(MATMUL_DTYPE)   # identity, bf16 read
        out = _epilogue(y3, sc3, sh3, residual=res)
    return out[:M2, :Cout].reshape(N, Ho, Wo, Cout)


# ----------------------------------------------------------------------------
# Pure-JAX reference (training-mode BN, matches the PyTorch module)
# ----------------------------------------------------------------------------
def ref_bottleneck(x, params, *, downsample=False, dilation=1):
    Cin = x.shape[-1]
    Cmid = params["w1"].shape[1]
    Cout = params["w3"].shape[1]
    s = 2 if downsample else 1
    dn = ("NHWC", "HWIO", "NHWC")
    hp = lax.Precision.HIGHEST

    def bn(y, g, b):
        mean = jnp.mean(y, axis=(0, 1, 2))
        var = jnp.var(y, axis=(0, 1, 2))
        return (y - mean) * lax.rsqrt(var + EPS) * g.reshape(-1) + b.reshape(-1)

    o = lax.conv_general_dilated(x, params["w1"].reshape(1, 1, Cin, Cmid),
                                 (1, 1), "VALID", dimension_numbers=dn, precision=hp)
    o = jax.nn.relu(bn(o, params["g1"], params["b1"]))
    o = lax.conv_general_dilated(o, params["w2"], (s, s),
                                 [(dilation, dilation), (dilation, dilation)],
                                 rhs_dilation=(dilation, dilation),
                                 dimension_numbers=dn, precision=hp)
    o = jax.nn.relu(bn(o, params["g2"], params["b2"]))
    o = lax.conv_general_dilated(o, params["w3"].reshape(1, 1, Cmid, Cout),
                                 (1, 1), "VALID", dimension_numbers=dn, precision=hp)
    o = bn(o, params["g3"], params["b3"])
    if (Cin != Cout) or downsample:
        res = lax.conv_general_dilated(x, params["wm"].reshape(1, 1, Cin, Cout),
                                       (s, s), "VALID", dimension_numbers=dn,
                                       precision=hp)
    else:
        res = x
    return jax.nn.relu(o + res)


# ----------------------------------------------------------------------------
if __name__ == "__main__":
    root = jax.random.PRNGKey(0)

    configs = [
        # (N, H, W, Cin, Cout, downsample, dilation)
        (2, 16, 16, 16, 32, True, 1),   # stride-2 projection residual (im2col path)
        (2, 10, 10, 16, 16, False, 2),  # identity residual, dilation 2 (tap path)
        (2, 16, 16, 16, 32, False, 1),  # stride-1 projection residual (tap path)
    ]

    for idx, (N, H, W, Cin, Cout, downsample, dilation) in enumerate(configs):
        ks = jax.random.split(jax.random.fold_in(root, idx), 11)
        Cmid = Cin // 4
        f32 = jnp.float32
        params = {
            "w1": 0.2 * jax.random.normal(ks[0], (Cin, Cmid), f32),
            "w2": 0.2 * jax.random.normal(ks[1], (3, 3, Cmid, Cmid), f32),
            "w3": 0.2 * jax.random.normal(ks[2], (Cmid, Cout), f32),
            "wm": 0.2 * jax.random.normal(ks[3], (Cin, Cout), f32),
            "g1": 1.0 + 0.1 * jax.random.normal(ks[4], (Cmid,), f32),
            "b1": 0.1 * jax.random.normal(ks[5], (Cmid,), f32),
            "g2": 1.0 + 0.1 * jax.random.normal(ks[6], (Cmid,), f32),
            "b2": 0.1 * jax.random.normal(ks[7], (Cmid,), f32),
            "g3": 1.0 + 0.1 * jax.random.normal(ks[8], (Cout,), f32),
            "b3": 0.1 * jax.random.normal(ks[9], (Cout,), f32),
        }
        x = jax.random.normal(ks[10], (N, H, W, Cin), f32)  # layout: NHWC

        out = jax.block_until_ready(
            bottleneck_forward(x, params, downsample=downsample, dilation=dilation))
        ref = jax.block_until_ready(
            ref_bottleneck(x, params, downsample=downsample, dilation=dilation))

        assert out.shape == ref.shape, (out.shape, ref.shape)
        # bf16 MXU inputs vs f32 HIGHEST-precision reference -> a few % tolerance
        if not jnp.allclose(out, ref, rtol=5e-2, atol=5e-2):
            max_err = float(jnp.max(jnp.abs(out - ref)))
            raise AssertionError(
                f"config {idx}: mismatch vs reference, max abs err = {max_err}")

    print("KERNEL_OK")
</pallas_src>

<mosaic_0001>
module attributes {stable_mosaic.version = 11 : i64} {
  func.func @_mm_stats_kernel(%arg0: i32, %arg1: memref<512x128xbf16, #tpu.memory_space<vmem>>, %arg2: memref<128x128xbf16, #tpu.memory_space<vmem>>, %arg3: memref<512x128xbf16, #tpu.memory_space<vmem>>, %arg4: memref<1x2x128xf32, #tpu.memory_space<vmem>>) attributes {dimension_semantics = [#tpu.dimension_semantics<parallel>], iteration_bounds = array<i64: 1>, scalar_prefetch = 0 : i64, scratch_operands = 0 : i64, tpu.core_type = #tpu.core_type<tc>, window_params = [{transform_indices = @transform_0, window_bounds = array<i64: 512, 128>}, {pipeline_mode = #tpu.pipeline_mode<synchronous>, transform_indices = @transform_1, window_bounds = array<i64: 128, 128>}, {transform_indices = @transform_2, window_bounds = array<i64: 512, 128>}, {transform_indices = @transform_3, window_bounds = array<i64: 1, 2, 128>}]} {
    %c0 = arith.constant 0 : index
    %c0_0 = arith.constant 0 : index
    %0 = vector.load %arg1[%c0, %c0_0] : memref<512x128xbf16, #tpu.memory_space<vmem>>, vector<512x128xbf16>
    %c0_1 = arith.constant 0 : index
    %c0_2 = arith.constant 0 : index
    %1 = vector.load %arg2[%c0_1, %c0_2] : memref<128x128xbf16, #tpu.memory_space<vmem>>, vector<128x128xbf16>
    %cst = arith.constant dense<0.000000e+00> : vector<512x128xf32>
    %2 = tpu.matmul %0, %1, %cst {dimension_numbers = #tpu.dot_dimension_numbers<[1], [0], [0], [1], [0, 0, 1, 1], [], []>} : vector<512x128xbf16>, vector<128x128xbf16>, vector<512x128xf32> -> vector<512x128xf32>
    %3 = arith.truncf %2 : vector<512x128xf32> to vector<512x128xbf16>
    %c0_3 = arith.constant 0 : index
    %c0_4 = arith.constant 0 : index
    %4 = vector.load %arg3[%c0_3, %c0_4] : memref<512x128xbf16, #tpu.memory_space<vmem>>, vector<512x128xbf16>
    tpu.vector_store %arg3[%c0_3, %c0_4], %3 {strides = array<i32>} : memref<512x128xbf16, #tpu.memory_space<vmem>>, vector<512x128xbf16>,
    %cst_5 = arith.constant dense<0.000000e+00> : vector<128xf32>
    %5 = vector.multi_reduction <add>, %2, %cst_5 [0] : vector<512x128xf32> to vector<128xf32>
    %6 = vector.shape_cast %5 : vector<128xf32> to vector<1x128xf32>
    %c0_6 = arith.constant 0 : index
    %c0_7 = arith.constant 0 : index
    %c0_8 = arith.constant 0 : index
    %7 = vector.load %arg4[%c0_6, %c0_7, %c0_8] : memref<1x2x128xf32, #tpu.memory_space<vmem>>, vector<1x1x128xf32>
    %8 = vector.shape_cast %7 : vector<1x1x128xf32> to vector<1x128xf32>
    %9 = vector.shape_cast %6 : vector<1x128xf32> to vector<1x1x128xf32>
    tpu.vector_store %arg4[%c0_6, %c0_7, %c0_8], %9 {strides = array<i32>} : memref<1x2x128xf32, #tpu.memory_space<vmem>>, vector<1x1x128xf32>,
    %10 = arith.mulf %2, %2 : vector<512x128xf32>
    %cst_9 = arith.constant dense<0.000000e+00> : vector<128xf32>
    %11 = vector.multi_reduction <add>, %10, %cst_9 [0] : vector<512x128xf32> to vector<128xf32>
    %12 = vector.shape_cast %11 : vector<128xf32> to vector<1x128xf32>
    %c0_10 = arith.constant 0 : index
    %c1 = arith.constant 1 : index
    %c0_11 = arith.constant 0 : index
    %13 = vector.load %arg4[%c0_10, %c1, %c0_11] : memref<1x2x128xf32, #tpu.memory_space<vmem>>, vector<1x1x128xf32>
    %14 = vector.shape_cast %13 : vector<1x1x128xf32> to vector<1x128xf32>
    %15 = vector.shape_cast %12 : vector<1x128xf32> to vector<1x1x128xf32>
    tpu.vector_store %arg4[%c0_10, %c1, %c0_11], %15 {strides = array<i32>} : memref<1x2x128xf32, #tpu.memory_space<vmem>>, vector<1x1x128xf32>,
    return
  }
  func.func @transform_0(%arg0: i32) -> (i32, i32) {
    %c0_i32 = arith.constant 0 : i32
    %c0_i32_0 = arith.constant 0 : i32
    return %arg0, %c0_i32 : i32, i32
  }
  func.func @transform_1(%arg0: i32) -> (i32, i32) {
    %c0_i32 = arith.constant 0 : i32
    %c0_i32_0 = arith.constant 0 : i32
    %c0_i32_1 = arith.constant 0 : i32
    return %c0_i32, %c0_i32_0 : i32, i32
  }
  func.func @transform_2(%arg0: i32) -> (i32, i32) {
    %c0_i32 = arith.constant 0 : i32
    %c0_i32_0 = arith.constant 0 : i32
    return %arg0, %c0_i32 : i32, i32
  }
  func.func @transform_3(%arg0: i32) -> (i32, i32, i32) {
    %c0_i32 = arith.constant 0 : i32
    %c0_i32_0 = arith.constant 0 : i32
    %c0_i32_1 = arith.constant 0 : i32
    return %arg0, %c0_i32, %c0_i32_0 : i32, i32, i32
  }
}

</mosaic_0001>

<bundles_post_ra>
// kernel: tpu_custom_call.1
= control target key start
LH: loop header
LB: loop body
LE: loop exit
PB: predicated region body
PF: predicated region fallthrough
CT: control target
= control target key end

     0   :  { %9 = vsyncpa [#allocation3], 0  ;;  %s2077_s0 = inlined_call_operand.hbm [shape: bf16[512,128], index: 0, kind: input, shape index: {}]   ;;  %s2078_s1 = inlined_call_operand.hbm [shape: bf16[128,128], index: 1, kind: input, shape index: {}]   ;;  %s2079_s2 = inlined_call_operand.hbm [shape: bf16[512,128], index: 2, kind: output, shape index: {0}]   ;;  %s2080_s3 = inlined_call_operand.hbm [shape: f32[1,2,128], index: 3, kind: output, shape index: {1}]  }
   0x1   :  { %10 = vsyncpa [#allocation6], 0 }
   0x2   :  { %11 = vsyncpa [#allocation4], 0 }
   0x3   :  { %12 = vsyncpa [#allocation9], 0  ;;  %s1838_s12 = smov [#allocation2]  }
   0x4   :  { %s18_s13 = sshll.u32 %s1838_s12, 4  ;;  %s19_s13 = int_to_ptr.vmem [resolvable:$true] %s18_s13 }
   0x5   :  { %s1758_s14 = scalar_lea.vmem %s19_s13, 4096  ;;  %p1763_p1 = scmp.lt.s32.totalorder %s19_s13, %s19_s13 }
   0x6   :  { %p1759_p0 = scmp.ne.s32.totalorder %s19_s13, %s1758_s14  ;;  %p1764_p2 = scmp.lt.s32.totalorder %s1758_s14, %s1758_s14 }
   0x8   :  { %p1765_p3 = por %p1764_p2, %p1763_p1 }
   0xa   :  { %p1766_p4 = pnand %p1765_p3, %p1759_p0 }
   0xc   :  { %1769 = shalt.err (!%p1766_p4)
}
   0xd   :  { %s1839_s15 = smov 64   ;;  %s1840_s16 = smov 4  }
   0xe   :  { %24 = dma.hbm_to_vmem [thread:$0]  %s2077_s0, 4096, %s19_s13, [#allocation3], %s1839_s15, %s1839_s15, %s1840_s16  }
   0xf   :  { %s1841_s19 = smov [#allocation5]  }
  0x10   :  { %s30_s20 = sshll.u32 %s1841_s19, 4  ;;  %s31_s20 = int_to_ptr.vmem [resolvable:$true] %s30_s20 }
  0x11   :  { %s1778_s21 = scalar_lea.vmem %s31_s20, 1024  ;;  %p1783_p6 = scmp.lt.s32.totalorder %s31_s20, %s31_s20 }
  0x12   :  { %p1779_p5 = scmp.ne.s32.totalorder %s31_s20, %s1778_s21  ;;  %p1784_p7 = scmp.lt.s32.totalorder %s1778_s21, %s1778_s21 }
  0x14   :  { %p1785_p8 = por %p1784_p7, %p1783_p6 }
  0x16   :  { %p1786_p9 = pnand %p1785_p8, %p1779_p5 }
  0x18   :  { %1789 = shalt.err (!%p1786_p9)
}
  0x19   :  { %36 = dma.hbm_to_vmem [thread:$0]  %s2078_s1, 1024, %s31_s20, [#allocation6], %s1839_s15, %s1839_s15, %s1840_s16  }
  0x1a   :  { %1830 = dma.done.wait [#allocation3], 4096  }
  0x1b   :  { %1831 = vsyncadd [#allocation3], 4294963200 }
  0x1c   :  { %1832 = dma.done.wait [#allocation6], 1024  }
  0x1d   :  { %1833 = vsyncadd [#allocation6], 4294966272  ;;  %v1710_v0 = vld [vmem:[#allocation5 + $0x38] sm:$0xff]   ;;  %v1711_v1 = vld [vmem:[#allocation5 + $0x30] sm:$0xff]   ;;  %s1842_s0 = smov [#allocation7]  }
  0x1e   :  { %1608 = vmatprep.subr.bf16.mxu0 %v1710_v0  ;;  %1688 = vmatprep.subr.bf16.mxu1 %v1710_v0  ;;  %v1712_v2 = vld [vmem:[#allocation5 + $0x28] sm:$0xff]   ;;  %v1713_v3 = vld [vmem:[#allocation5 + $0x20] sm:$0xff]   ;;  %v1714_v5 = vld [vmem:[#allocation5 + $0x18] sm:$0xff]   ;;  %s1182_s1 = sshll.u32 %s1842_s0, 4  ;;  %s1183_s1 = int_to_ptr.vmem [resolvable:$true] %s1182_s1 }
  0x1f   :  { %1609 = vmatpush3.bf16.msra.mxu0 %v1710_v0  ;;  %1696 = vmatpush3.bf16.msra.mxu1 %v1710_v0  ;;  %v1718_v4 = vld [vmem:[#allocation2] sm:$0xff]   ;;  %v1715_v6 = vld [vmem:[#allocation5 + $0x10] sm:$0xff]   ;;  %v1716_v7 = vld [vmem:[#allocation5 + $0x8] sm:$0xff]   ;;  %s1790_s24 = scalar_lea.vmem %s1183_s1, 4096  ;;  %p1795_p11 = scmp.lt.s32.totalorder %s1183_s1, %s1183_s1 }
  0x20   :  { %1610 = vmatprep.subr.bf16.mxu0 %v1711_v1  ;;  %1689 = vmatprep.subr.bf16.mxu1 %v1711_v1  ;;  %v1717_v8 = vld [vmem:[#allocation5] sm:$0xff]   ;;  %v1719_v10 = vld [vmem:[#allocation2 + $0x8] sm:$0xff]   ;;  %v1720_v11 = vld [vmem:[#allocation2 + $0x10] sm:$0xff]   ;;  %p1791_p10 = scmp.ne.s32.totalorder %s1183_s1, %s1790_s24  ;;  %p1796_p12 = scmp.lt.s32.totalorder %s1790_s24, %s1790_s24 }
  0x21   :  { %1624 = vmatprep.mubr.bf16.mxu0 %v1718_v4  ;;  %v1734_v9 = vld [vmem:[#allocation2 + $0x80] sm:$0xff]   ;;  %v1735_v12 = vld [vmem:[#allocation2 + $0x88] sm:$0xff]   ;;  %v1736_v13 = vld [vmem:[#allocation2 + $0x90] sm:$0xff]  }
  0x22   :  { %1656 = vmatprep.mubr.bf16.mxu1 %v1734_v9  ;;  %v1721_v14 = vld [vmem:[#allocation2 + $0x18] sm:$0xff]   ;;  %v1722_v15 = vld [vmem:[#allocation2 + $0x20] sm:$0xff]   ;;  %v1723_v18 = vld [vmem:[#allocation2 + $0x28] sm:$0xff]   ;;  %p1797_p13 = por %p1796_p12, %p1795_p11 }
  0x23   :  { %1611 = vmatpush3.bf16.msra.mxu0 %v1711_v1  ;;  %1697 = vmatpush3.bf16.msra.mxu1 %v1711_v1  ;;  %v1737_v16 = vld [vmem:[#allocation2 + $0x98] sm:$0xff]   ;;  %v1738_v17 = vld [vmem:[#allocation2 + $0xa0] sm:$0xff]   ;;  %v1739_v19 = vld [vmem:[#allocation2 + $0xa8] sm:$0xff]  }
  0x24   :  { %1612 = vmatprep.subr.bf16.mxu0 %v1712_v2  ;;  %1690 = vmatprep.subr.bf16.mxu1 %v1712_v2  ;;  %v1724_v20 = vld [vmem:[#allocation2 + $0x30] sm:$0xff]   ;;  %v1725_v22 = vld [vmem:[#allocation2 + $0x38] sm:$0xff]   ;;  %v1726_v24 = vld [vmem:[#allocation2 + $0x40] sm:$0xff]   ;;  %p1798_p0 = pnand %p1797_p13, %p1791_p10 }
  0x25   :  { %v1740_v21 = vld [vmem:[#allocation2 + $0xb0] sm:$0xff]   ;;  %v1741_v23 = vld [vmem:[#allocation2 + $0xb8] sm:$0xff]   ;;  %v1742_v25 = vld [vmem:[#allocation2 + $0xc0] sm:$0xff]  }
  0x26   :  { %v1727_v26 = vld [vmem:[#allocation2 + $0x48] sm:$0xff]   ;;  %v1728_v28 = vld [vmem:[#allocation2 + $0x50] sm:$0xff]   ;;  %v1729_v30 = vld [vmem:[#allocation2 + $0x58] sm:$0xff]  }
  0x27   :  { %1613 = vmatpush3.bf16.msra.mxu0 %v1712_v2  ;;  %1698 = vmatpush3.bf16.msra.mxu1 %v1712_v2  ;;  %v1743_v27 = vld [vmem:[#allocation2 + $0xc8] sm:$0xff]   ;;  %v1744_v29 = vld [vmem:[#allocation2 + $0xd0] sm:$0xff]   ;;  %v1745_v31 = vld [vmem:[#allocation2 + $0xd8] sm:$0xff]  }
  0x28   :  { %1614 = vmatprep.subr.bf16.mxu0 %v1713_v3  ;;  %1691 = vmatprep.subr.bf16.mxu1 %v1713_v3  ;;  %v1730_v32 = vld [vmem:[#allocation2 + $0x60] sm:$0xff]   ;;  %v1731_v34 = vld [vmem:[#allocation2 + $0x68] sm:$0xff]   ;;  %v1732_v36 = vld [vmem:[#allocation2 + $0x70] sm:$0xff]  }
  0x29   :  { %v1746_v33 = vld [vmem:[#allocation2 + $0xe0] sm:$0xff]   ;;  %v1747_v35 = vld [vmem:[#allocation2 + $0xe8] sm:$0xff]   ;;  %v1748_v37 = vld [vmem:[#allocation2 + $0xf0] sm:$0xff]  }
  0x2a   :  { %v1733_v38 = vld [vmem:[#allocation2 + $0x78] sm:$0xff]  }
  0x2b   :  { %1615 = vmatpush3.bf16.msra.mxu0 %v1713_v3  ;;  %1699 = vmatpush3.bf16.msra.mxu1 %v1713_v3  ;;  %v1749_v39 = vld [vmem:[#allocation2 + $0xf8] sm:$0xff]  }
  0x2c   :  { %1616 = vmatprep.subr.bf16.mxu0 %v1714_v5  ;;  %1692 = vmatprep.subr.bf16.mxu1 %v1714_v5 }
  0x2f   :  { %1617 = vmatpush3.bf16.msra.mxu0 %v1714_v5  ;;  %1700 = vmatpush3.bf16.msra.mxu1 %v1714_v5 }
  0x30   :  { %1618 = vmatprep.subr.bf16.mxu0 %v1715_v6  ;;  %1693 = vmatprep.subr.bf16.mxu1 %v1715_v6 }
  0x33   :  { %1619 = vmatpush3.bf16.msra.mxu0 %v1715_v6  ;;  %1701 = vmatpush3.bf16.msra.mxu1 %v1715_v6 }
  0x34   :  { %1620 = vmatprep.subr.bf16.mxu0 %v1716_v7  ;;  %1694 = vmatprep.subr.bf16.mxu1 %v1716_v7 }
  0x37   :  { %1621 = vmatpush3.bf16.msra.mxu0 %v1716_v7  ;;  %1702 = vmatpush3.bf16.msra.mxu1 %v1716_v7 }
  0x38   :  { %1622 = vmatprep.subr.bf16.mxu0 %v1717_v8  ;;  %1695 = vmatprep.subr.bf16.mxu1 %v1717_v8 }
  0x3b   :  { %1623 = vmatpush3.bf16.msra.mxu0 %v1717_v8  ;;  %1703 = vmatpush3.bf16.msra.mxu1 %v1717_v8 }
  0x3e   :  { %1625 = vmatmul.mubr.bf16.vlgmr.msra.gmra.mxu0 %v1719_v10  ;;  %1657 = vmatmul.mubr.bf16.vlgmr.msra.gmra.mxu1 %v1735_v12 }
  0x3f   :  { %1628 = vmatprep.mubr.bf16.mxu0 %v1720_v11  ;;  %1660 = vmatprep.mubr.bf16.mxu1 %v1736_v13 }
  0x46   :  { %1629 = vmatmul.mubr.bf16.gmra.mxu0 %v1721_v14  ;;  %1661 = vmatmul.mubr.bf16.gmra.mxu1 %v1737_v16 }
  0x47   :  { %1632 = vmatprep.mubr.bf16.mxu0 %v1722_v15  ;;  %1664 = vmatprep.mubr.bf16.mxu1 %v1738_v17 }
  0x4e   :  { %1633 = vmatmul.mubr.bf16.gmra.mxu0 %v1723_v18  ;;  %1665 = vmatmul.mubr.bf16.gmra.mxu1 %v1739_v19 }
  0x4f   :  { %1636 = vmatprep.mubr.bf16.mxu0 %v1724_v20  ;;  %1668 = vmatprep.mubr.bf16.mxu1 %v1740_v21 }
  0x56   :  { %1637 = vmatmul.mubr.bf16.gmra.mxu0 %v1725_v22  ;;  %1669 = vmatmul.mubr.bf16.gmra.mxu1 %v1741_v23 }
  0x57   :  { %1640 = vmatprep.mubr.bf16.mxu0 %v1726_v24  ;;  %1672 = vmatprep.mubr.bf16.mxu1 %v1742_v25 }
  0x5e   :  { %1641 = vmatmul.mubr.bf16.gmra.mxu0 %v1727_v26  ;;  %1673 = vmatmul.mubr.bf16.gmra.mxu1 %v1743_v27 }
  0x5f   :  { %1644 = vmatprep.mubr.bf16.mxu0 %v1728_v28  ;;  %1676 = vmatprep.mubr.bf16.mxu1 %v1744_v29 }
  0x66   :  { %1645 = vmatmul.mubr.bf16.gmra.mxu0 %v1729_v30  ;;  %1677 = vmatmul.mubr.bf16.gmra.mxu1 %v1745_v31 }
  0x67   :  { %1648 = vmatprep.mubr.bf16.mxu0 %v1730_v32  ;;  %1680 = vmatprep.mubr.bf16.mxu1 %v1746_v33 }
  0x6e   :  { %1649 = vmatmul.mubr.bf16.gmra.mxu0 %v1731_v34  ;;  %1681 = vmatmul.mubr.bf16.gmra.mxu1 %v1747_v35 }
  0x6f   :  { %1652 = vmatprep.mubr.bf16.mxu0 %v1732_v36  ;;  %1684 = vmatprep.mubr.bf16.mxu1 %v1748_v37 }
  0x76   :  { %1653 = vmatmul.mubr.bf16.gmra.mxu0 %v1733_v38  ;;  %1685 = vmatmul.mubr.bf16.gmra.mxu1 %v1749_v39 }
  0xfe   :  { %v1626_v40 = vpop.f32.mrf.mxu0  ;;  %v1876_v41 = vpop.f32.mrf.mxu1 }
  0xff   :  { %v1045_v57 = vmul.f32 %v1626_v40, %v1626_v40 }
 0x100   :  { %v398_v42 = vpop.f32.mrf.mxu0  ;;  %v1878_v43 = vpop.f32.mrf.mxu1 }
 0x101   :  { %v1043_v48 = vmul.f32 %v398_v42, %v398_v42 }
 0x102   :  { %v1627_v44 = vpop.f32.mrf.mxu0  ;;  %v1880_v45 = vpop.f32.mrf.mxu1 }
 0x103   :  { %v1385_v46 = vpack.c.bf16 %v1627_v44, %v1626_v40  ;;  %v1465_v47 = vpack.c.bf16 %v1880_v45, %v1876_v41  ;;  %v1046_v62 = vmul.f32 %v1627_v44, %v1627_v44 }
 0x104   :  { %v401_v49 = vpop.f32.mrf.mxu0  ;;  %v1884_v50 = vpop.f32.mrf.mxu1 }
 0x105   :  { %1537 = vst [vmem:[#allocation7 + $0x8] sm:$0xff] %v1385_v46   ;;  %v1380_v51 = vpack.c.bf16 %v401_v49, %v398_v42  ;;  %v973_v52 = vadd.f32 %v401_v49, %v398_v42  ;;  %v1044_v53 = vmul.f32 %v401_v49, %v401_v49  ;;  %1553 = vst [vmem:[#allocation7 + $0x88] sm:$0xff] %v1465_v47  }
 0x106   :  { %v1460_v54 = vpack.c.bf16 %v1884_v50, %v1878_v43  ;;  %v1630_v55 = vpop.f32.mrf.mxu0  ;;  %v1888_v56 = vpop.f32.mrf.mxu1 }
 0x107   :  { %1381 = vst [vmem:[#allocation7] sm:$0xff] %v1380_v51   ;;  %v974_v58 = vadd.f32 %v1626_v40, %v973_v52  ;;  %v1107_v59 = vadd.f32 %v1044_v53, %v1043_v48  ;;  %v1049_v17 = vmul.f32 %v1630_v55, %v1630_v55 }
 0x108   :  { %1552 = vst [vmem:[#allocation7 + $0x80] sm:$0xff] %v1460_v54   ;;  %v414_v60 = vpop.f32.mrf.mxu0  ;;  %v1890_v61 = vpop.f32.mrf.mxu1 }
 0x109   :  { %v1108_v63 = vadd.f32 %v1107_v59, %v1045_v57  ;;  %v975_v0 = vadd.f32 %v1627_v44, %v974_v58  ;;  %v1047_v4 = vmul.f32 %v414_v60, %v414_v60 }
 0x10a   :  { %v1631_v1 = vpop.f32.mrf.mxu0  ;;  %v1892_v2 = vpop.f32.mrf.mxu1 }
 0x10b   :  { %v976_v3 = vadd.f32 %v975_v0, %v414_v60  ;;  %v1109_v5 = vadd.f32 %v1108_v63, %v1046_v62  ;;  %v1395_v6 = vpack.c.bf16 %v1631_v1, %v1630_v55  ;;  %v1475_v8 = vpack.c.bf16 %v1892_v2, %v1888_v56 }
 0x10c   :  { %v417_v7 = vpop.f32.mrf.mxu0  ;;  %v1896_v9 = vpop.f32.mrf.mxu1  ;;  %v1050_v22 = vmul.f32 %v1631_v1, %v1631_v1 }
 0x10d   :  { %v1110_v10 = vadd.f32 %v1109_v5, %v1047_v4  ;;  %1539 = vst [vmem:[#allocation7 + $0x18] sm:$0xff] %v1395_v6   ;;  %v1390_v11 = vpack.c.bf16 %v417_v7, %v414_v60  ;;  %v977_v12 = vadd.f32 %v976_v3, %v417_v7  ;;  %v1048_v13 = vmul.f32 %v417_v7, %v417_v7 }
 0x10e   :  { %v1634_v14 = vpop.f32.mrf.mxu0  ;;  %1555 = vst [vmem:[#allocation7 + $0x98] sm:$0xff] %v1475_v8   ;;  %v1470_v15 = vpack.c.bf16 %v1896_v9, %v1890_v61  ;;  %v1900_v16 = vpop.f32.mrf.mxu1 }
 0x10f   :  { %1538 = vst [vmem:[#allocation7 + $0x10] sm:$0xff] %v1390_v11   ;;  %v978_v18 = vadd.f32 %v1630_v55, %v977_v12  ;;  %v1111_v19 = vadd.f32 %v1110_v10, %v1048_v13  ;;  %v1053_v42 = vmul.f32 %v1634_v14, %v1634_v14 }
 0x110   :  { %v430_v20 = vpop.f32.mrf.mxu0  ;;  %1554 = vst [vmem:[#allocation7 + $0x90] sm:$0xff] %v1470_v15   ;;  %v1902_v21 = vpop.f32.mrf.mxu1 }
 0x111   :  { %v1112_v23 = vadd.f32 %v1111_v19, %v1049_v17  ;;  %v979_v24 = vadd.f32 %v1631_v1, %v978_v18  ;;  %v1051_v28 = vmul.f32 %v430_v20, %v430_v20 }
 0x112   :  { %v1635_v25 = vpop.f32.mrf.mxu0  ;;  %v1904_v26 = vpop.f32.mrf.mxu1 }
 0x113   :  { %v980_v27 = vadd.f32 %v979_v24, %v430_v20  ;;  %v1113_v29 = vadd.f32 %v1112_v23, %v1050_v22  ;;  %v1405_v30 = vpack.c.bf16 %v1635_v25, %v1634_v14  ;;  %v1485_v32 = vpack.c.bf16 %v1904_v26, %v1900_v16 }
 0x114   :  { %v433_v31 = vpop.f32.mrf.mxu0  ;;  %v1908_v33 = vpop.f32.mrf.mxu1  ;;  %v1054_v49 = vmul.f32 %v1635_v25, %v1635_v25 }
 0x115   :  { %v1114_v34 = vadd.f32 %v1113_v29, %v1051_v28  ;;  %1541 = vst [vmem:[#allocation7 + $0x28] sm:$0xff] %v1405_v30   ;;  %v1400_v35 = vpack.c.bf16 %v433_v31, %v430_v20  ;;  %v981_v36 = vadd.f32 %v980_v27, %v433_v31  ;;  %v1052_v37 = vmul.f32 %v433_v31, %v433_v31 }
 0x116   :  { %v1638_v38 = vpop.f32.mrf.mxu0  ;;  %1557 = vst [vmem:[#allocation7 + $0xa8] sm:$0xff] %v1485_v32   ;;  %v1480_v39 = vpack.c.bf16 %v1908_v33, %v1902_v21  ;;  %v1912_v40 = vpop.f32.mrf.mxu1 }
 0x117   :  { %1540 = vst [vmem:[#allocation7 + $0x20] sm:$0xff] %v1400_v35   ;;  %v982_v44 = vadd.f32 %v1634_v14, %v981_v36  ;;  %v1115_v46 = vadd.f32 %v1114_v34, %v1052_v37  ;;  %v1057_v8 = vmul.f32 %v1638_v38, %v1638_v38 }
 0x118   :  { %v446_v47 = vpop.f32.mrf.mxu0  ;;  %1556 = vst [vmem:[#allocation7 + $0xa0] sm:$0xff] %v1480_v39   ;;  %v1914_v48 = vpop.f32.mrf.mxu1 }
 0x119   :  { %v1116_v51 = vadd.f32 %v1115_v46, %v1053_v42  ;;  %v983_v52 = vadd.f32 %v1635_v25, %v982_v44  ;;  %v1055_v57 = vmul.f32 %v446_v47, %v446_v47 }
 0x11a   :  { %v1639_v53 = vpop.f32.mrf.mxu0  ;;  %v1916_v54 = vpop.f32.mrf.mxu1 }
 0x11b   :  { %v984_v55 = vadd.f32 %v983_v52, %v446_v47  ;;  %v1117_v58 = vadd.f32 %v1116_v51, %v1054_v49  ;;  %v1415_v59 = vpack.c.bf16 %v1639_v53, %v1638_v38  ;;  %v1495_v62 = vpack.c.bf16 %v1916_v54, %v1912_v40 }
 0x11c   :  { %v449_v60 = vpop.f32.mrf.mxu0  ;;  %v1920_v63 = vpop.f32.mrf.mxu1  ;;  %v1058_v14 = vmul.f32 %v1639_v53, %v1639_v53 }
 0x11d   :  { %v1118_v0 = vadd.f32 %v1117_v58, %v1055_v57  ;;  %1543 = vst [vmem:[#allocation7 + $0x38] sm:$0xff] %v1415_v59   ;;  %v1410_v1 = vpack.c.bf16 %v449_v60, %v446_v47  ;;  %v985_v3 = vadd.f32 %v984_v55, %v449_v60  ;;  %v1056_v4 = vmul.f32 %v449_v60, %v449_v60 }
 0x11e   :  { %v1642_v5 = vpop.f32.mrf.mxu0  ;;  %1559 = vst [vmem:[#allocation7 + $0xb8] sm:$0xff] %v1495_v62   ;;  %v1490_v6 = vpack.c.bf16 %v1920_v63, %v1914_v48  ;;  %v1924_v7 = vpop.f32.mrf.mxu1 }
 0x11f   :  { %1542 = vst [vmem:[#allocation7 + $0x30] sm:$0xff] %v1410_v1   ;;  %v986_v10 = vadd.f32 %v1638_v38, %v985_v3  ;;  %v1119_v11 = vadd.f32 %v1118_v0, %v1056_v4  ;;  %v1061_v37 = vmul.f32 %v1642_v5, %v1642_v5 }
 0x120   :  { %v462_v12 = vpop.f32.mrf.mxu0  ;;  %1558 = vst [vmem:[#allocation7 + $0xb0] sm:$0xff] %v1490_v6   ;;  %v1926_v13 = vpop.f32.mrf.mxu1 }
 0x121   :  { %v1120_v15 = vadd.f32 %v1119_v11, %v1057_v8  ;;  %v987_v17 = vadd.f32 %v1639_v53, %v986_v10  ;;  %v1059_v22 = vmul.f32 %v462_v12, %v462_v12 }
 0x122   :  { %v1643_v18 = vpop.f32.mrf.mxu0  ;;  %v1928_v19 = vpop.f32.mrf.mxu1 }
 0x123   :  { %v988_v20 = vadd.f32 %v987_v17, %v462_v12  ;;  %v1121_v23 = vadd.f32 %v1120_v15, %v1058_v14  ;;  %v1425_v24 = vpack.c.bf16 %v1643_v18, %v1642_v5  ;;  %v1505_v27 = vpack.c.bf16 %v1928_v19, %v1924_v7 }
 0x124   :  { %v465_v25 = vpop.f32.mrf.mxu0  ;;  %v1932_v28 = vpop.f32.mrf.mxu1  ;;  %v1062_v46 = vmul.f32 %v1643_v18, %v1643_v18 }
 0x125   :  { %v1122_v29 = vadd.f32 %v1121_v23, %v1059_v22  ;;  %1545 = vst [vmem:[#allocation7 + $0x48] sm:$0xff] %v1425_v24   ;;  %v1420_v30 = vpack.c.bf16 %v465_v25, %v462_v12  ;;  %v989_v31 = vadd.f32 %v988_v20, %v465_v25  ;;  %v1060_v32 = vmul.f32 %v465_v25, %v465_v25 }
 0x126   :  { %v1646_v34 = vpop.f32.mrf.mxu0  ;;  %1561 = vst [vmem:[#allocation7 + $0xc8] sm:$0xff] %v1505_v27   ;;  %v1500_v35 = vpack.c.bf16 %v1932_v28, %v1926_v13  ;;  %v1936_v36 = vpop.f32.mrf.mxu1 }
 0x127   :  { %1544 = vst [vmem:[#allocation7 + $0x40] sm:$0xff] %v1420_v30   ;;  %v990_v38 = vadd.f32 %v1642_v5, %v989_v31  ;;  %v1123_v39 = vadd.f32 %v1122_v29, %v1060_v32  ;;  %v1065_v10 = vmul.f32 %v1646_v34, %v1646_v34 }
 0x128   :  { %v478_v42 = vpop.f32.mrf.mxu0  ;;  %1560 = vst [vmem:[#allocation7 + $0xc0] sm:$0xff] %v1500_v35   ;;  %v1938_v44 = vpop.f32.mrf.mxu1 }
 0x129   :  { %v1124_v47 = vadd.f32 %v1123_v39, %v1061_v37  ;;  %v991_v49 = vadd.f32 %v1643_v18, %v990_v38  ;;  %v1063_v55 = vmul.f32 %v478_v42, %v478_v42 }
 0x12a   :  { %v1647_v51 = vpop.f32.mrf.mxu0  ;;  %v1940_v52 = vpop.f32.mrf.mxu1 }
 0x12b   :  { %v992_v53 = vadd.f32 %v991_v49, %v478_v42  ;;  %v1125_v57 = vadd.f32 %v1124_v47, %v1062_v46  ;;  %v1435_v58 = vpack.c.bf16 %v1647_v51, %v1646_v34  ;;  %v1515_v60 = vpack.c.bf16 %v1940_v52, %v1936_v36 }
 0x12c   :  { %v481_v59 = vpop.f32.mrf.mxu0  ;;  %v1944_v62 = vpop.f32.mrf.mxu1  ;;  %v1066_v17 = vmul.f32 %v1647_v51, %v1647_v51 }
 0x12d   :  { %v1126_v0 = vadd.f32 %v1125_v57, %v1063_v55  ;;  %1547 = vst [vmem:[#allocation7 + $0x58] sm:$0xff] %v1435_v58   ;;  %v1430_v1 = vpack.c.bf16 %v481_v59, %v478_v42  ;;  %v993_v3 = vadd.f32 %v992_v53, %v481_v59  ;;  %v1064_v4 = vmul.f32 %v481_v59, %v481_v59 }
 0x12e   :  { %v1650_v5 = vpop.f32.mrf.mxu0  ;;  %1563 = vst [vmem:[#allocation7 + $0xd8] sm:$0xff] %v1515_v60   ;;  %v1510_v6 = vpack.c.bf16 %v1944_v62, %v1938_v44  ;;  %v1948_v8 = vpop.f32.mrf.mxu1 }
 0x12f   :  { %1546 = vst [vmem:[#allocation7 + $0x50] sm:$0xff] %v1430_v1   ;;  %v994_v11 = vadd.f32 %v1646_v34, %v993_v3  ;;  %v1127_v12 = vadd.f32 %v1126_v0, %v1064_v4  ;;  %v1069_v47 = vmul.f32 %v1650_v5, %v1650_v5 }
 0x130   :  { %v494_v14 = vpop.f32.mrf.mxu0  ;;  %1562 = vst [vmem:[#allocation7 + $0xd0] sm:$0xff] %v1510_v6   ;;  %v1950_v15 = vpop.f32.mrf.mxu1 }
 0x131   :  { %v1128_v18 = vadd.f32 %v1127_v12, %v1065_v10  ;;  %v995_v20 = vadd.f32 %v1647_v51, %v994_v11  ;;  %v1067_v25 = vmul.f32 %v494_v14, %v494_v14 }
 0x132   :  { %v1651_v22 = vpop.f32.mrf.mxu0  ;;  %v1952_v23 = vpop.f32.mrf.mxu1 }
 0x133   :  { %v996_v24 = vadd.f32 %v995_v20, %v494_v14  ;;  %v1129_v27 = vadd.f32 %v1128_v18, %v1066_v17  ;;  %v1445_v29 = vpack.c.bf16 %v1651_v22, %v1650_v5  ;;  %v1525_v31 = vpack.c.bf16 %v1952_v23, %v1948_v8 }
 0x134   :  { %v497_v30 = vpop.f32.mrf.mxu0  ;;  %v1956_v32 = vpop.f32.mrf.mxu1  ;;  %v1070_v57 = vmul.f32 %v1651_v22, %v1651_v22 }
 0x135   :  { %v1130_v34 = vadd.f32 %v1129_v27, %v1067_v25  ;;  %1549 = vst [vmem:[#allocation7 + $0x68] sm:$0xff] %v1445_v29   ;;  %v1440_v35 = vpack.c.bf16 %v497_v30, %v494_v14  ;;  %v997_v37 = vadd.f32 %v996_v24, %v497_v30  ;;  %v1068_v38 = vmul.f32 %v497_v30, %v497_v30 }
 0x136   :  { %v1654_v39 = vpop.f32.mrf.mxu0  ;;  %1565 = vst [vmem:[#allocation7 + $0xe8] sm:$0xff] %v1525_v31   ;;  %v1520_v42 = vpack.c.bf16 %v1956_v32, %v1950_v15  ;;  %v1960_v46 = vpop.f32.mrf.mxu1 }
 0x137   :  { %1548 = vst [vmem:[#allocation7 + $0x60] sm:$0xff] %v1440_v35   ;;  %v998_v49 = vadd.f32 %v1650_v5, %v997_v37  ;;  %v1131_v51 = vadd.f32 %v1130_v34, %v1068_v38 }
 0x138   :  { %v510_v53 = vpop.f32.mrf.mxu0  ;;  %1564 = vst [vmem:[#allocation7 + $0xe0] sm:$0xff] %v1520_v42   ;;  %v1962_v55 = vpop.f32.mrf.mxu1 }
 0x139   :  { %v1132_v58 = vadd.f32 %v1131_v51, %v1069_v47  ;;  %v999_v59 = vadd.f32 %v1651_v22, %v998_v49  ;;  %v1071_v3 = vmul.f32 %v510_v53, %v510_v53  ;;  %v1073_v22 = vmul.f32 %v1654_v39, %v1654_v39 }
 0x13a   :  { %v1655_v60 = vpop.f32.mrf.mxu0  ;;  %v1964_v0 = vpop.f32.mrf.mxu1 }
 0x13b   :  { %v1000_v1 = vadd.f32 %v999_v59, %v510_v53  ;;  %v1133_v4 = vadd.f32 %v1132_v58, %v1070_v57  ;;  %v1455_v6 = vpack.c.bf16 %v1655_v60, %v1654_v39  ;;  %v1535_v5 = vpack.c.bf16 %v1964_v0, %v1960_v46 }
 0x13c   :  { %v513_v10 = vpop.f32.mrf.mxu0  ;;  %v1968_v11 = vpop.f32.mrf.mxu1  ;;  %v1074_v27 = vmul.f32 %v1655_v60, %v1655_v60 }
 0x13d   :  { %v1134_v12 = vadd.f32 %v1133_v4, %v1071_v3  ;;  %1551 = vst [vmem:[#allocation7 + $0x78] sm:$0xff] %v1455_v6   ;;  %v1450_v14 = vpack.c.bf16 %v513_v10, %v510_v53  ;;  %v1001_v17 = vadd.f32 %v1000_v1, %v513_v10  ;;  %v1072_v18 = vmul.f32 %v513_v10, %v513_v10 }
 0x13e   :  { %1567 = vst [vmem:[#allocation7 + $0xf8] sm:$0xff] %v1535_v5   ;;  %v1530_v20 = vpack.c.bf16 %v1968_v11, %v1962_v55 }
 0x13f   :  { %1550 = vst [vmem:[#allocation7 + $0x70] sm:$0xff] %v1450_v14   ;;  %v1002_v24 = vadd.f32 %v1654_v39, %v1001_v17  ;;  %v1135_v25 = vadd.f32 %v1134_v12, %v1072_v18 }
 0x140   :  { %1566 = vst [vmem:[#allocation7 + $0xf0] sm:$0xff] %v1530_v20  }
 0x141   :  { %v1003_v29 = vadd.f32 %v1655_v60, %v1002_v24  ;;  %v1136_v30 = vadd.f32 %v1135_v25, %v1073_v22 }
 0x142   :  { %1801 = shalt.err (!%p1798_p0)
}
 0x143   :  { %1188 = dma.vmem_to_hbm [thread:$0]  %s1183_s1, 4096, %s2079_s2, [#allocation4], %s1839_s15, %s1839_s15, %s1840_s16   ;;  %v1075_v31 = vmul.f32 %v1878_v43, %v1878_v43  ;;  %v1137_v34 = vadd.f32 %v1136_v30, %v1074_v27  ;;  %v1004_v35 = vadd.f32 %v1003_v29, %v1878_v43  ;;  %v1076_v38 = vmul.f32 %v1884_v50, %v1884_v50 }
 0x144   :  { %v1077_v42 = vmul.f32 %v1876_v41, %v1876_v41  ;;  %v1078_v51 = vmul.f32 %v1880_v45, %v1880_v45  ;;  %v1079_v58 = vmul.f32 %v1890_v61, %v1890_v61  ;;  %v1080_v1 = vmul.f32 %v1896_v9, %v1896_v9  ;;  %s1843_s2 = smov [#allocation8]  }
 0x145   :  { %v1005_v37 = vadd.f32 %v1004_v35, %v1884_v50  ;;  %v1138_v39 = vadd.f32 %v1137_v34, %v1075_v31  ;;  %v1083_v5 = vmul.f32 %v1902_v21, %v1902_v21  ;;  %v1084_v17 = vmul.f32 %v1908_v33, %v1908_v33  ;;  %s1195_s27 = sshll.u32 %s1843_s2, 4  ;;  %s1196_s27 = int_to_ptr.vmem [resolvable:$true] %s1195_s27 }
 0x146   :  { %v1087_v25 = vmul.f32 %v1914_v48, %v1914_v48  ;;  %v1088_v30 = vmul.f32 %v1920_v63, %v1920_v63  ;;  %s1810_s28 = scalar_lea.vmem %s1196_s27, 32  ;;  %p1815_p2 = scmp.lt.s32.totalorder %s1196_s27, %s1196_s27 }
 0x147   :  { %v1006_v47 = vadd.f32 %v1876_v41, %v1005_v37  ;;  %v1139_v49 = vadd.f32 %v1138_v39, %v1076_v38  ;;  %v1081_v41 = vmul.f32 %v1888_v56, %v1888_v56  ;;  %v1091_v38 = vmul.f32 %v1926_v13, %v1926_v13  ;;  %p1811_p1 = scmp.ne.s32.totalorder %s1196_s27, %s1810_s28  ;;  %p1816_p3 = scmp.lt.s32.totalorder %s1810_s28, %s1810_s28 }
 0x149   :  { %v1140_v53 = vadd.f32 %v1139_v49, %v1077_v42  ;;  %v1007_v57 = vadd.f32 %v1880_v45, %v1006_v47  ;;  %v1082_v45 = vmul.f32 %v1892_v2, %v1892_v2  ;;  %v1092_v47 = vmul.f32 %v1932_v28, %v1932_v28  ;;  %p1817_p4 = por %p1816_p3, %p1815_p2 }
 0x14b   :  { %v1008_v43 = vadd.f32 %v1007_v57, %v1890_v61  ;;  %v1141_v59 = vadd.f32 %v1140_v53, %v1078_v51  ;;  %p1818_p5 = pnand %p1817_p4, %p1811_p1 }
 0x14d   :  { %v1142_v50 = vadd.f32 %v1141_v59, %v1079_v58  ;;  %v1009_v60 = vadd.f32 %v1008_v43, %v1896_v9  ;;  %v1095_v43 = vmul.f32 %v1938_v44, %v1938_v44 }
 0x14f   :  { %v1010_v3 = vadd.f32 %v1888_v56, %v1009_v60  ;;  %v1143_v4 = vadd.f32 %v1142_v50, %v1080_v1  ;;  %v1085_v56 = vmul.f32 %v1900_v16, %v1900_v16  ;;  %v1096_v50 = vmul.f32 %v1944_v62, %v1944_v62 }
 0x151   :  { %v1144_v6 = vadd.f32 %v1143_v4, %v1081_v41  ;;  %v1011_v10 = vadd.f32 %v1892_v2, %v1010_v3  ;;  %v1086_v2 = vmul.f32 %v1904_v26, %v1904_v26  ;;  %v1099_v4 = vmul.f32 %v1950_v15, %v1950_v15 }
 0x153   :  { %v1012_v61 = vadd.f32 %v1011_v10, %v1902_v21  ;;  %v1145_v12 = vadd.f32 %v1144_v6, %v1082_v45  ;;  %v1100_v10 = vmul.f32 %v1956_v32, %v1956_v32 }
 0x155   :  { %v1146_v14 = vadd.f32 %v1145_v12, %v1083_v5  ;;  %v1013_v9 = vadd.f32 %v1012_v61, %v1908_v33 }
 0x157   :  { %v1014_v18 = vadd.f32 %v1900_v16, %v1013_v9  ;;  %v1147_v20 = vadd.f32 %v1146_v14, %v1084_v17  ;;  %v1089_v16 = vmul.f32 %v1912_v40, %v1912_v40  ;;  %v1103_v9 = vmul.f32 %v1962_v55, %v1962_v55 }
 0x159   :  { %v1148_v22 = vadd.f32 %v1147_v20, %v1085_v56  ;;  %v1015_v24 = vadd.f32 %v1904_v26, %v1014_v18  ;;  %v1090_v26 = vmul.f32 %v1916_v54, %v1916_v54  ;;  %v1104_v18 = vmul.f32 %v1968_v11, %v1968_v11 }
 0x15b   :  { %v1016_v21 = vadd.f32 %v1015_v24, %v1914_v48  ;;  %v1149_v27 = vadd.f32 %v1148_v22, %v1086_v2 }
 0x15d   :  { %v1150_v29 = vadd.f32 %v1149_v27, %v1087_v25  ;;  %v1017_v33 = vadd.f32 %v1016_v21, %v1920_v63 }
 0x15f   :  { %v1018_v31 = vadd.f32 %v1912_v40, %v1017_v33  ;;  %v1151_v34 = vadd.f32 %v1150_v29, %v1088_v30  ;;  %v1093_v40 = vmul.f32 %v1924_v7, %v1924_v7 }
 0x161   :  { %v1152_v35 = vadd.f32 %v1151_v34, %v1089_v16  ;;  %v1019_v37 = vadd.f32 %v1916_v54, %v1018_v31  ;;  %v1094_v54 = vmul.f32 %v1928_v19, %v1928_v19 }
 0x163   :  { %v1020_v48 = vadd.f32 %v1019_v37, %v1926_v13  ;;  %v1153_v39 = vadd.f32 %v1152_v35, %v1090_v26 }
 0x165   :  { %v1154_v42 = vadd.f32 %v1153_v39, %v1091_v38  ;;  %v1021_v63 = vadd.f32 %v1020_v48, %v1932_v28 }
 0x167   :  { %v1022_v49 = vadd.f32 %v1924_v7, %v1021_v63  ;;  %v1155_v51 = vadd.f32 %v1154_v42, %v1092_v47  ;;  %v1097_v7 = vmul.f32 %v1936_v36, %v1936_v36 }
 0x169   :  { %v1156_v53 = vadd.f32 %v1155_v51, %v1093_v40  ;;  %v1023_v57 = vadd.f32 %v1928_v19, %v1022_v49  ;;  %v1098_v19 = vmul.f32 %v1940_v52, %v1940_v52 }
 0x16b   :  { %v1024_v13 = vadd.f32 %v1023_v57, %v1938_v44  ;;  %v1157_v58 = vadd.f32 %v1156_v53, %v1094_v54 }
 0x16d   :  { %v1158_v59 = vadd.f32 %v1157_v58, %v1095_v43  ;;  %v1025_v28 = vadd.f32 %v1024_v13, %v1944_v62 }
 0x16f   :  { %v1026_v60 = vadd.f32 %v1936_v36, %v1025_v28  ;;  %v1159_v1 = vadd.f32 %v1158_v59, %v1096_v50  ;;  %v1101_v36 = vmul.f32 %v1948_v8, %v1948_v8 }
 0x171   :  { %v1160_v41 = vadd.f32 %v1159_v1, %v1097_v7  ;;  %v1027_v3 = vadd.f32 %v1940_v52, %v1026_v60  ;;  %v1102_v52 = vmul.f32 %v1952_v23, %v1952_v23 }
 0x173   :  { %v1028_v44 = vadd.f32 %v1027_v3, %v1950_v15  ;;  %v1161_v45 = vadd.f32 %v1160_v41, %v1098_v19 }
 0x175   :  { %v1162_v6 = vadd.f32 %v1161_v45, %v1099_v4  ;;  %v1029_v62 = vadd.f32 %v1028_v44, %v1956_v32 }
 0x177   :  { %v1030_v61 = vadd.f32 %v1948_v8, %v1029_v62  ;;  %v1163_v5 = vadd.f32 %v1162_v6, %v1100_v10  ;;  %v1105_v8 = vmul.f32 %v1960_v46, %v1960_v46 }
 0x179   :  { %v1164_v12 = vadd.f32 %v1163_v5, %v1101_v36  ;;  %v1031_v14 = vadd.f32 %v1952_v23, %v1030_v61  ;;  %v1106_v23 = vmul.f32 %v1964_v0, %v1964_v0 }
 0x17b   :  { %v1032_v15 = vadd.f32 %v1031_v14, %v1962_v55  ;;  %v1165_v17 = vadd.f32 %v1164_v12, %v1102_v52 }
 0x17d   :  { %v1166_v56 = vadd.f32 %v1165_v17, %v1103_v9  ;;  %v1033_v32 = vadd.f32 %v1032_v15, %v1968_v11 }
 0x17f   :  { %v1034_v20 = vadd.f32 %v1960_v46, %v1033_v32  ;;  %v1167_v2 = vadd.f32 %v1166_v56, %v1104_v18 }
 0x181   :  { %v1035_v22 = vadd.f32 %v1964_v0, %v1034_v20  ;;  %v1168_v24 = vadd.f32 %v1167_v2, %v1105_v8 }
 0x183   :  { %v1036_v55 = vrot.slane %v1035_v22, 4  ;;  %v1169_v21 = vadd.f32 %v1168_v24, %v1106_v23 }
 0x185   :  { %v1037_v25 = vadd.f32 %v1036_v55, %v1035_v22  ;;  %v1170_v27 = vrot.slane %v1169_v21, 4 }
 0x187   :  { %v1038_v29 = vrot.slane %v1037_v25, 2  ;;  %v1171_v33 = vadd.f32 %v1170_v27, %v1169_v21 }
 0x189   :  { %v1039_v30 = vadd.f32 %v1038_v29, %v1037_v25  ;;  %v1172_v11 = vrot.slane %v1171_v33, 2 }
 0x18b   :  { %v1040_v16 = vrot.slane %v1039_v30, 1  ;;  %v1173_v31 = vadd.f32 %v1172_v11, %v1171_v33 }
 0x18d   :  { %v1041_v46 = vadd.f32 %v1040_v16, %v1039_v30  ;;  %v1174_v34 = vrot.slane %v1173_v31, 1 }
 0x18f   :  { %1042 = vst [vmem:[#allocation8] sm:$0x1] %v1041_v46  ;;  %v1175_v26 = vadd.f32 %v1174_v34, %v1173_v31 }
 0x191   :  { %1176 = vst [vmem:[#allocation8 + $0x1] sm:$0x1] %v1175_v26 }
 0x192   :  { %1821 = shalt.err (!%p1818_p5)
}
 0x193   :  { %1198 = dma.vmem_to_hbm [thread:$0]  %s1196_s27, 32, %s2080_s3, [#allocation9]  }
 0x194   :  { %1834 = dma.done.wait [#allocation4], 4096  }
 0x195   :  { %1835 = vsyncadd [#allocation4], 4294963200 }
 0x196   :  { %1836 = dma.done.wait [#allocation9], 32  }
 0x197   :  { %1837 = vsyncadd [#allocation9], 4294967264 }
 0x198   :  { %1205 = vsyncpa [#allocation3], 1 }
 0x199   :  { %1206 = vsyncpa [#allocation6], 1 }
 0x19a   :  { %1207 = vsyncpa [#allocation4], 1 }
 0x19b   :  { %1208 = vsyncpa [#allocation9], 1 }

</bundles_post_ra>
